<compile_context>
chip_gen: v7x
topology: tpu7x:2x2x1
jax: 0.10.0
libtpu: 0.0.40
codegen_flags: <defaults>
</compile_context>

<pallas_src>
import functools

import jax
import jax.numpy as jnp
from jax.experimental import pallas as pl
from jax.experimental.pallas import tpu as pltpu

_MiB = 1024 * 1024


# --------------------------------------------------------------------------
# VMEM / tiling heuristics
# --------------------------------------------------------------------------
def _vmem_budgets():
    """Generation-aware VMEM sizing (v5e/v6e: 128 MiB per TC, v7x: 64 MiB)."""
    cap = 128 * _MiB
    try:
        info = pltpu.get_tpu_info()
        cap_q = int(getattr(info, "vmem_capacity_bytes", 0) or 0)
        if cap_q > 0:
            cap = cap_q
    except Exception:
        # Query unavailable -> assume the smallest production part (v7x).
        cap = 64 * _MiB
    usable = (3 * cap) // 4          # ~96 MiB on 128-MiB parts, ~48 MiB on v7x
    # Per-step x-tile budget: 4x tile for double-buffered in+out blocks plus
    # ~1x tile of compiler temporaries, plus fixed headroom for weights etc.
    tile_budget = max(2 * _MiB, (usable - 8 * _MiB) // 5)
    return usable, tile_budget


def _vmem_limit(usable, tile_bytes, weight_bytes):
    need = 5 * tile_bytes + weight_bytes + 6 * _MiB
    return int(min(usable, max(16 * _MiB, need)))


def _choose_batch_tile(B, C, hw_block, itemsize, budget_bytes, target_steps=8):
    """Largest divisor of B that (a) fits the VMEM tile budget and (b) keeps
    at least ~target_steps grid steps so double-buffering / megacore work."""
    per_batch = max(1, C * hw_block * itemsize)
    cap_fit = max(1, budget_bytes // per_batch)
    cap_steps = max(1, B // min(target_steps, B))
    tb = max(1, min(B, cap_fit, cap_steps))
    while B % tb != 0:
        tb -= 1
    # Prefer a multiple of 4 so the (2*tb, C) pooled matmul fills MXU sublanes.
    if tb >= 4 and tb % 4 != 0:
        tb4 = tb - (tb % 4)
        if tb4 >= 4 and B % tb4 == 0:
            tb = tb4
    return tb


def _choose_hw_tile(HW, C, tb, itemsize, budget_bytes, b_steps, target_steps=8):
    """HW tile (multiple of 128, divisor of HW) for the two-pass kernels."""
    if HW % 128 != 0:
        return HW  # full-HW block (see TODO about padding to lane density)
    n_chunks = HW // 128
    per_chunk = max(1, tb * C * 128 * itemsize)
    cap_fit = max(1, budget_bytes // per_chunk)
    want_hw_steps = max(1, -(-target_steps // max(1, b_steps)))  # ceil div
    cap_steps = max(1, n_chunks // want_hw_steps)
    c = max(1, min(n_chunks, cap_fit, cap_steps))
    while n_chunks % c != 0:
        c -= 1
    return c * 128


# --------------------------------------------------------------------------
# Kernels
# --------------------------------------------------------------------------
def _fused_kernel(x_ref, w1_ref, b1_ref, w2_ref, b2_ref, o_ref):
    """Single-pass: pool -> MLP -> sigmoid -> scale-multiply for one batch tile."""
    tb = x_ref.shape[0]
    hw = x_ref.shape[-1]

    # Pooling: f32 accumulation for the sum via the reduction dtype, max kept
    # in the input dtype -- no full-tile f32 materialization.
    xt = x_ref[...]
    avg_pool = jnp.sum(xt, axis=-1, dtype=jnp.float32) * (1.0 / float(hw))
    max_pool = jnp.max(xt, axis=-1).astype(jnp.float32)

    # Shared MLP: both pooled vectors in one MXU pass per layer.
    pooled = jnp.concatenate([avg_pool, max_pool], axis=0)          # (2*tb, C)
    h = jnp.dot(pooled, w1_ref[...], preferred_element_type=jnp.float32)
    h = jnp.maximum(h + b1_ref[...], 0.0)
    att = jnp.dot(h, w2_ref[...], preferred_element_type=jnp.float32) + b2_ref[...]
    scale = jax.nn.sigmoid(att[:tb] + att[tb:])                     # (tb, C) f32

    # Streaming load -> broadcast multiply -> store epilogue.
    o_ref[...] = x_ref[...] * scale.astype(o_ref.dtype)[:, :, None]


def _pool_mlp_kernel(x_ref, w1_ref, b1_ref, w2_ref, b2_ref, s_ref,
                     sum_acc, max_acc, *, inv_hw):
    """Two-pass, pass 1: streamed pooling over HW tiles + MLP -> (tb, C, 1) scale."""
    hw_idx = pl.program_id(1)
    tb = x_ref.shape[0]

    @pl.when(hw_idx == 0)
    def _():
        sum_acc[...] = jnp.zeros_like(sum_acc)
        max_acc[...] = jnp.full_like(max_acc, -jnp.inf)

    xt = x_ref[...]
    sum_acc[...] = sum_acc[...] + jnp.sum(xt, axis=-1, dtype=jnp.float32)
    max_acc[...] = jnp.maximum(max_acc[...],
                               jnp.max(xt, axis=-1).astype(jnp.float32))

    @pl.when(hw_idx == pl.num_programs(1) - 1)
    def _():
        pooled = jnp.concatenate([sum_acc[...] * inv_hw, max_acc[...]], axis=0)
        h = jnp.dot(pooled, w1_ref[...], preferred_element_type=jnp.float32)
        h = jnp.maximum(h + b1_ref[...], 0.0)
        att = (jnp.dot(h, w2_ref[...], preferred_element_type=jnp.float32)
               + b2_ref[...])
        scale = jax.nn.sigmoid(att[:tb] + att[tb:])                 # (tb, C)
        s_ref[...] = scale[:, :, None].astype(s_ref.dtype)


def _scale_mul_kernel(x_ref, s_ref, o_ref):
    """Two-pass, pass 2: o = x * scale (scale resident per batch tile)."""
    o_ref[...] = (x_ref[...] * s_ref[...].astype(x_ref.dtype)).astype(o_ref.dtype)


# --------------------------------------------------------------------------
# Wrapper
# --------------------------------------------------------------------------
def channel_gate(x, w1, b1, w2, b2, *, single_pass=None,
                 batch_tile=None, hw_tile=None):
    """CBAM ChannelGate forward.

    x: (B, C, H, W). w1: (C, Cr), b1: (Cr,), w2: (Cr, C), b2: (C,).
    Weights are stored (in, out), i.e. transposed relative to torch.nn.Linear,
    so the kernel computes p @ W + b.
    """
    B, C, H, W = x.shape
    Cr = w1.shape[1]
    HW = H * W
    itemsize = jnp.dtype(x.dtype).itemsize

    usable_vmem, tile_budget = _vmem_budgets()
    weight_bytes = (C * Cr + Cr + Cr * C + C) * 4

    x3 = x.reshape(B, C, HW)
    b1_2d = b1.reshape(1, Cr)
    b2_2d = b2.reshape(1, C)

    per_batch_bytes = C * HW * itemsize
    if single_pass is None:
        # Fused path only when one batch slice fits the tile budget AND the
        # batch axis alone yields enough grid steps to pipeline and feed both
        # v7x TensorCores; otherwise use the two-pass design whose grid is
        # independent of B and handles arbitrarily large feature maps.
        single_pass = (per_batch_bytes <= tile_budget) and (B >= 8)

    if single_pass:
        tb = batch_tile if batch_tile is not None else _choose_batch_tile(
            B, C, HW, itemsize, tile_budget)
        assert B % tb == 0, "batch_tile must divide the batch size"
        tile_bytes = tb * C * HW * itemsize
        cost = pl.CostEstimate(
            flops=3 * B * C * HW + 8 * B * C * Cr,
            transcendentals=B * C,
            bytes_accessed=2 * B * C * HW * itemsize + weight_bytes,
        )
        out3 = pl.pallas_call(
            _fused_kernel,
            out_shape=jax.ShapeDtypeStruct((B, C, HW), x.dtype),
            grid_spec=pltpu.PrefetchScalarGridSpec(
                num_scalar_prefetch=0,
                grid=(B // tb,),
                in_specs=[
                    pl.BlockSpec((tb, C, HW), lambda b: (b, 0, 0)),  # x (streamed)
                    pl.BlockSpec((C, Cr), lambda b: (0, 0)),          # w1 (resident)
                    pl.BlockSpec((1, Cr), lambda b: (0, 0)),          # b1
                    pl.BlockSpec((Cr, C), lambda b: (0, 0)),          # w2
                    pl.BlockSpec((1, C), lambda b: (0, 0)),           # b2
                ],
                out_specs=pl.BlockSpec((tb, C, HW), lambda b: (b, 0, 0)),
            ),
            compiler_params=pltpu.CompilerParams(
                dimension_semantics=("parallel",),
                vmem_limit_bytes=_vmem_limit(usable_vmem, tile_bytes, weight_bytes),
            ),
            cost_estimate=cost,
        )(x3, w1, b1_2d, w2, b2_2d)
        return out3.reshape(B, C, H, W)

    # ------------------------------ two-pass ------------------------------
    lane_tileable = (HW % 128 == 0) and (HW > 128)
    min_hw = 128 if lane_tileable else HW
    tb = batch_tile if batch_tile is not None else _choose_batch_tile(
        B, C, min_hw, itemsize, tile_budget)
    assert B % tb == 0, "batch_tile must divide the batch size"
    if hw_tile is not None:
        thw = hw_tile
    elif lane_tileable:
        thw = _choose_hw_tile(HW, C, tb, itemsize, tile_budget, B // tb)
    else:
        thw = HW
    assert HW % thw == 0, "hw_tile must divide H*W"

    tile_bytes = tb * C * thw * itemsize
    vmem_limit = _vmem_limit(usable_vmem, tile_bytes, weight_bytes)
    grid = (B // tb, HW // thw)

    # Pass 1: streamed pooling (f32 running sum / max) + tiny MLP -> scale.
    pool_cost = pl.CostEstimate(
        flops=2 * B * C * HW + 8 * B * C * Cr,
        transcendentals=B * C,
        bytes_accessed=B * C * HW * itemsize + weight_bytes + B * C * 4,
    )
    scale = pl.pallas_call(
        functools.partial(_pool_mlp_kernel, inv_hw=1.0 / float(HW)),
        out_shape=jax.ShapeDtypeStruct((B, C, 1), jnp.float32),
        grid_spec=pltpu.PrefetchScalarGridSpec(
            num_scalar_prefetch=0,
            grid=grid,
            in_specs=[
                pl.BlockSpec((tb, C, thw), lambda b, h: (b, 0, h)),
                pl.BlockSpec((C, Cr), lambda b, h: (0, 0)),
                pl.BlockSpec((1, Cr), lambda b, h: (0, 0)),
                pl.BlockSpec((Cr, C), lambda b, h: (0, 0)),
                pl.BlockSpec((1, C), lambda b, h: (0, 0)),
            ],
            out_specs=pl.BlockSpec((tb, C, 1), lambda b, h: (b, 0, 0)),
            scratch_shapes=[
                pltpu.VMEM((tb, C), jnp.float32),   # running sum (f32)
                pltpu.VMEM((tb, C), jnp.float32),   # running max (f32)
            ],
        ),
        compiler_params=pltpu.CompilerParams(
            dimension_semantics=("parallel", "arbitrary"),
            vmem_limit_bytes=vmem_limit,
        ),
        cost_estimate=pool_cost,
    )(x3, w1, b1_2d, w2, b2_2d)

    # Pass 2: pure streamed x * scale; both grid axes parallel (megacore).
    mul_cost = pl.CostEstimate(
        flops=B * C * HW,
        transcendentals=0,
        bytes_accessed=2 * B * C * HW * itemsize + B * C * 4,
    )
    out3 = pl.pallas_call(
        _scale_mul_kernel,
        out_shape=jax.ShapeDtypeStruct((B, C, HW), x.dtype),
        grid_spec=pltpu.PrefetchScalarGridSpec(
            num_scalar_prefetch=0,
            grid=grid,
            in_specs=[
                pl.BlockSpec((tb, C, thw), lambda b, h: (b, 0, h)),   # x (streamed)
                pl.BlockSpec((tb, C, 1), lambda b, h: (b, 0, 0)),      # scale (resident)
            ],
            out_specs=pl.BlockSpec((tb, C, thw), lambda b, h: (b, 0, h)),
        ),
        compiler_params=pltpu.CompilerParams(
            dimension_semantics=("parallel", "parallel"),
            vmem_limit_bytes=vmem_limit,
        ),
        cost_estimate=mul_cost,
    )(x3, scale)
    return out3.reshape(B, C, H, W)


# --------------------------------------------------------------------------
# Pure-JAX reference matching the PyTorch forward
# --------------------------------------------------------------------------
def reference_channel_gate(x, w1, b1, w2, b2):
    avg_pool = jnp.mean(x, axis=(2, 3))   # (B, C)
    max_pool = jnp.max(x, axis=(2, 3))    # (B, C)

    def mlp(p):
        h = jnp.maximum(p @ w1 + b1, 0.0)
        return h @ w2 + b2

    att = mlp(avg_pool) + mlp(max_pool)
    scale = jax.nn.sigmoid(att)[:, :, None, None]
    return x * scale


if __name__ == "__main__":
    # gate_channels=64, reduction_ratio=16 -> hidden = 4; H*W = 256 (lane-dense)
    B, C, H, W = 2, 64, 16, 16
    reduction_ratio = 16
    Cr = C // reduction_ratio

    key = jax.random.PRNGKey(0)
    kx, kw1, kb1, kw2, kb2 = jax.random.split(key, 5)

    x = jax.random.normal(kx, (B, C, H, W), dtype=jnp.float32)
    w1 = jax.random.normal(kw1, (C, Cr), dtype=jnp.float32) * 0.1
    b1 = jax.random.normal(kb1, (Cr,), dtype=jnp.float32) * 0.1
    w2 = jax.random.normal(kw2, (Cr, C), dtype=jnp.float32) * 0.1
    b2 = jax.random.normal(kb2, (C,), dtype=jnp.float32) * 0.1

    ref = reference_channel_gate(x, w1, b1, w2, b2)

    # Default path: tiny batch (B=2) selects the two-pass design, whose
    # (batch, HW-tile) grid pipelines regardless of B.
    out_two_pass = jax.block_until_ready(channel_gate(x, w1, b1, w2, b2))
    assert out_two_pass.shape == (B, C, H, W)
    assert jnp.allclose(out_two_pass, ref, atol=1e-5, rtol=1e-5), \
        "two-pass mismatch vs reference"

    # Fused single-pass path (used automatically for larger batches).
    out_fused = jax.block_until_ready(
        channel_gate(x, w1, b1, w2, b2, single_pass=True))
    assert jnp.allclose(out_fused, ref, atol=1e-5, rtol=1e-5), \
        "fused mismatch vs reference"

    print("KERNEL_OK")
</pallas_src>

<mosaic_0001>
module attributes {stable_mosaic.version = 11 : i64} {
  func.func @_pool_mlp_kernel(%arg0: i32, %arg1: i32, %arg2: memref<1x64x128xf32, #tpu.memory_space<vmem>>, %arg3: memref<64x4xf32, #tpu.memory_space<vmem>>, %arg4: memref<1x4xf32, #tpu.memory_space<vmem>>, %arg5: memref<4x64xf32, #tpu.memory_space<vmem>>, %arg6: memref<1x64xf32, #tpu.memory_space<vmem>>, %arg7: memref<1x64x1xf32, #tpu.memory_space<vmem>>, %arg8: memref<1x64xf32, #tpu.memory_space<vmem>>, %arg9: memref<1x64xf32, #tpu.memory_space<vmem>>) attributes {dimension_semantics = [#tpu.dimension_semantics<parallel>, #tpu.dimension_semantics<arbitrary>], iteration_bounds = array<i64: 2, 2>, scalar_prefetch = 0 : i64, scratch_operands = 2 : i64, tpu.core_type = #tpu.core_type<tc>, window_params = [{transform_indices = @transform_0, window_bounds = array<i64: 1, 64, 128>}, {pipeline_mode = #tpu.pipeline_mode<synchronous>, transform_indices = @transform_1, window_bounds = array<i64: 64, 4>}, {pipeline_mode = #tpu.pipeline_mode<synchronous>, transform_indices = @transform_2, window_bounds = array<i64: 1, 4>}, {pipeline_mode = #tpu.pipeline_mode<synchronous>, transform_indices = @transform_3, window_bounds = array<i64: 4, 64>}, {pipeline_mode = #tpu.pipeline_mode<synchronous>, transform_indices = @transform_4, window_bounds = array<i64: 1, 64>}, {transform_indices = @transform_5, window_bounds = array<i64: 1, 64, 1>}]} {
    %c0_i32 = arith.constant 0 : i32
    %0 = arith.cmpi eq, %arg1, %c0_i32 : i32
    %1 = arith.extui %0 : i1 to i32
    %c0_i32_0 = arith.constant 0 : i32
    %2 = arith.cmpi ne, %1, %c0_i32_0 : i32
    scf.if %2 {
      %cst_13 = arith.constant 0.000000e+00 : f32
      %15 = vector.broadcast %cst_13 : f32 to vector<1x64xf32>
      %c0_14 = arith.constant 0 : index
      %c0_15 = arith.constant 0 : index
      %16 = vector.load %arg8[%c0_14, %c0_15] : memref<1x64xf32, #tpu.memory_space<vmem>>, vector<1x64xf32>
      tpu.vector_store %arg8[%c0_14, %c0_15], %15 {strides = array<i32>} : memref<1x64xf32, #tpu.memory_space<vmem>>, vector<1x64xf32>,
      %cst_16 = arith.constant 0xFF800000 : f32
      %17 = vector.broadcast %cst_16 : f32 to vector<1x64xf32>
      %c0_17 = arith.constant 0 : index
      %c0_18 = arith.constant 0 : index
      %18 = vector.load %arg9[%c0_17, %c0_18] : memref<1x64xf32, #tpu.memory_space<vmem>>, vector<1x64xf32>
      tpu.vector_store %arg9[%c0_17, %c0_18], %17 {strides = array<i32>} : memref<1x64xf32, #tpu.memory_space<vmem>>, vector<1x64xf32>,
    } else {
    }
    %c0 = arith.constant 0 : index
    %c0_1 = arith.constant 0 : index
    %c0_2 = arith.constant 0 : index
    %3 = vector.load %arg2[%c0, %c0_1, %c0_2] : memref<1x64x128xf32, #tpu.memory_space<vmem>>, vector<1x64x128xf32>
    %c0_3 = arith.constant 0 : index
    %c0_4 = arith.constant 0 : index
    %4 = vector.load %arg8[%c0_3, %c0_4] : memref<1x64xf32, #tpu.memory_space<vmem>>, vector<1x64xf32>
    %cst = arith.constant dense<0.000000e+00> : vector<1x64xf32>
    %5 = vector.multi_reduction <add>, %3, %cst [2] : vector<1x64x128xf32> to vector<1x64xf32>
    %6 = arith.addf %4, %5 : vector<1x64xf32>
    %c0_5 = arith.constant 0 : index
    %c0_6 = arith.constant 0 : index
    %7 = vector.load %arg8[%c0_5, %c0_6] : memref<1x64xf32, #tpu.memory_space<vmem>>, vector<1x64xf32>
    tpu.vector_store %arg8[%c0_5, %c0_6], %6 {strides = array<i32>} : memref<1x64xf32, #tpu.memory_space<vmem>>, vector<1x64xf32>,
    %c0_7 = arith.constant 0 : index
    %c0_8 = arith.constant 0 : index
    %8 = vector.load %arg9[%c0_7, %c0_8] : memref<1x64xf32, #tpu.memory_space<vmem>>, vector<1x64xf32>
    %cst_9 = arith.constant dense<0xFF800000> : vector<1x64xf32>
    %9 = vector.multi_reduction <maximumf>, %3, %cst_9 [2] : vector<1x64x128xf32> to vector<1x64xf32>
    %10 = arith.maximumf %8, %9 : vector<1x64xf32>
    %c0_10 = arith.constant 0 : index
    %c0_11 = arith.constant 0 : index
    %11 = vector.load %arg9[%c0_10, %c0_11] : memref<1x64xf32, #tpu.memory_space<vmem>>, vector<1x64xf32>
    tpu.vector_store %arg9[%c0_10, %c0_11], %10 {strides = array<i32>} : memref<1x64xf32, #tpu.memory_space<vmem>>, vector<1x64xf32>,
    %c1_i32 = arith.constant 1 : i32
    %12 = arith.cmpi eq, %arg1, %c1_i32 : i32
    %13 = arith.extui %12 : i1 to i32
    %c0_i32_12 = arith.constant 0 : i32
    %14 = arith.cmpi ne, %13, %c0_i32_12 : i32
    scf.if %14 {
      %c0_13 = arith.constant 0 : index
      %c0_14 = arith.constant 0 : index
      %15 = vector.load %arg8[%c0_13, %c0_14] : memref<1x64xf32, #tpu.memory_space<vmem>>, vector<1x64xf32>
      %cst_15 = arith.constant 3.906250e-03 : f32
      %16 = vector.broadcast %cst_15 : f32 to vector<1x64xf32>
      %17 = arith.mulf %15, %16 : vector<1x64xf32>
      %c0_16 = arith.constant 0 : index
      %c0_17 = arith.constant 0 : index
      %18 = vector.load %arg9[%c0_16, %c0_17] : memref<1x64xf32, #tpu.memory_space<vmem>>, vector<1x64xf32>
      %19 = tpu.concatenate %17, %18 in 0 : vector<1x64xf32>, vector<1x64xf32> -> vector<2x64xf32>
      %c0_18 = arith.constant 0 : index
      %c0_19 = arith.constant 0 : index
      %20 = vector.load %arg3[%c0_18, %c0_19] : memref<64x4xf32, #tpu.memory_space<vmem>>, vector<64x4xf32>
      %cst_20 = arith.constant dense<0.000000e+00> : vector<2x4xf32>
      %21 = tpu.matmul %19, %20, %cst_20 {dimension_numbers = #tpu.dot_dimension_numbers<[1], [0], [0], [1], [0, 0, 1, 1], [], []>} : vector<2x64xf32>, vector<64x4xf32>, vector<2x4xf32> -> vector<2x4xf32>
      %c0_21 = arith.constant 0 : index
      %c0_22 = arith.constant 0 : index
      %22 = vector.load %arg4[%c0_21, %c0_22] : memref<1x4xf32, #tpu.memory_space<vmem>>, vector<1x4xf32>
      %23 = vector.broadcast %22 : vector<1x4xf32> to vector<2x4xf32>
      %24 = arith.addf %21, %23 : vector<2x4xf32>
      %cst_23 = arith.constant 0.000000e+00 : f32
      %25 = vector.broadcast %cst_23 : f32 to vector<2x4xf32>
      %26 = arith.maximumf %24, %25 : vector<2x4xf32>
      %c0_24 = arith.constant 0 : index
      %c0_25 = arith.constant 0 : index
      %27 = vector.load %arg5[%c0_24, %c0_25] : memref<4x64xf32, #tpu.memory_space<vmem>>, vector<4x64xf32>
      %cst_26 = arith.constant dense<0.000000e+00> : vector<2x64xf32>
      %28 = tpu.matmul %26, %27, %cst_26 {dimension_numbers = #tpu.dot_dimension_numbers<[1], [0], [0], [1], [0, 0, 1, 1], [], []>} : vector<2x4xf32>, vector<4x64xf32>, vector<2x64xf32> -> vector<2x64xf32>
      %c0_27 = arith.constant 0 : index
      %c0_28 = arith.constant 0 : index
      %29 = vector.load %arg6[%c0_27, %c0_28] : memref<1x64xf32, #tpu.memory_space<vmem>>, vector<1x64xf32>
      %30 = vector.broadcast %29 : vector<1x64xf32> to vector<2x64xf32>
      %31 = arith.addf %28, %30 : vector<2x64xf32>
      %32 = vector.extract_strided_slice %31 {offsets = [0, 0], sizes = [1, 64], strides = [1, 1]} : vector<2x64xf32> to vector<1x64xf32>
      %33 = vector.extract_strided_slice %31 {offsets = [1, 0], sizes = [1, 64], strides = [1, 1]} : vector<2x64xf32> to vector<1x64xf32>
      %34 = arith.addf %32, %33 : vector<1x64xf32>
      %35 = arith.negf %34 : vector<1x64xf32>
      %36 = math.exp %35 : vector<1x64xf32>
      %cst_29 = arith.constant 1.000000e+00 : f32
      %37 = vector.broadcast %cst_29 : f32 to vector<1x64xf32>
      %38 = arith.addf %37, %36 : vector<1x64xf32>
      %39 = arith.divf %37, %38 : vector<1x64xf32>
      %40 = vector.shape_cast %39 : vector<1x64xf32> to vector<1x64x1xf32>
      %c0_30 = arith.constant 0 : index
      %c0_31 = arith.constant 0 : index
      %c0_32 = arith.constant 0 : index
      %41 = vector.load %arg7[%c0_30, %c0_31, %c0_32] : memref<1x64x1xf32, #tpu.memory_space<vmem>>, vector<1x64x1xf32>
      tpu.vector_store %arg7[%c0_30, %c0_31, %c0_32], %40 {strides = array<i32>} : memref<1x64x1xf32, #tpu.memory_space<vmem>>, vector<1x64x1xf32>,
    } else {
    }
    return
  }
  func.func @transform_0(%arg0: i32, %arg1: i32) -> (i32, i32, i32) {
    %c0_i32 = arith.constant 0 : i32
    %c0_i32_0 = arith.constant 0 : i32
    return %arg0, %c0_i32, %arg1 : i32, i32, i32
  }
  func.func @transform_1(%arg0: i32, %arg1: i32) -> (i32, i32) {
    %c0_i32 = arith.constant 0 : i32
    %c0_i32_0 = arith.constant 0 : i32
    %c0_i32_1 = arith.constant 0 : i32
    return %c0_i32, %c0_i32_0 : i32, i32
  }
  func.func @transform_2(%arg0: i32, %arg1: i32) -> (i32, i32) {
    %c0_i32 = arith.constant 0 : i32
    %c0_i32_0 = arith.constant 0 : i32
    %c0_i32_1 = arith.constant 0 : i32
    return %c0_i32, %c0_i32_0 : i32, i32
  }
  func.func @transform_3(%arg0: i32, %arg1: i32) -> (i32, i32) {
    %c0_i32 = arith.constant 0 : i32
    %c0_i32_0 = arith.constant 0 : i32
    %c0_i32_1 = arith.constant 0 : i32
    return %c0_i32, %c0_i32_0 : i32, i32
  }
  func.func @transform_4(%arg0: i32, %arg1: i32) -> (i32, i32) {
    %c0_i32 = arith.constant 0 : i32
    %c0_i32_0 = arith.constant 0 : i32
    %c0_i32_1 = arith.constant 0 : i32
    return %c0_i32, %c0_i32_0 : i32, i32
  }
  func.func @transform_5(%arg0: i32, %arg1: i32) -> (i32, i32, i32) {
    %c0_i32 = arith.constant 0 : i32
    %c0_i32_0 = arith.constant 0 : i32
    %c0_i32_1 = arith.constant 0 : i32
    return %arg0, %c0_i32, %c0_i32_0 : i32, i32, i32
  }
}

</mosaic_0001>

<bundles_post_ra>
// kernel: tpu_custom_call.1
= control target key start
LH: loop header
LB: loop body
LE: loop exit
PB: predicated region body
PF: predicated region fallthrough
CT: control target
= control target key end

     0   :  { %10 = vsyncpa [#allocation5], 0  ;;  %s2981_s0 = inlined_call_operand.hbm [shape: f32[2,64,256], index: 0, kind: input, shape index: {}]   ;;  %s2982_s1 = inlined_call_operand.vmem [shape: f32[64,4], index: 1, kind: input, shape index: {}]   ;;  %s2983_s2 = inlined_call_operand.vmem [shape: f32[1,4], index: 2, kind: input, shape index: {}]   ;;  %s2984_s3 = inlined_call_operand.vmem [shape: f32[4,64], index: 3, kind: input, shape index: {}]   ;;  %s2985_s4 = inlined_call_operand.vmem [shape: f32[1,64], index: 4, kind: input, shape index: {}]   ;;  %s2986_s5 = inlined_call_operand.vmem [shape: f32[2,64,1], index: 5, kind: output, shape index: {}]  }
   0x1   :  { %12 = vsyncpa [#allocation5 + $0x1], 0  ;;  %s2419_s18 = smov 0   ;;  %s2421_s19 = smov 0  }
   0x2   :  { %s2423_s20 = smov 0   ;;  %s2425_s21 = smov 0  }
   0x3   :  { %s2427_s22 = smov 0   ;;  %s2429_s23 = smov 0  }
   0x4   :  { %s2431_s24 = smov 0   ;;  %s2433_s25 = smov 0  }
   0x5 LB: > { %s2123_s26 = sadd.s32 4294967295, %s2376_s25   ;;  %s27_s27 = sadd.s32 1, %s2368_s23  ;;  %s2376_s25 = sphi %s2433_s25, %s18_s25   ;;  %s2372_s24 = sphi %s2431_s24, %s3000_s24   ;;  %s2368_s23 = sphi %s2429_s23, %s2999_s23   ;;  %s2364_s22 = sphi %s2427_s22, %s2998_s22   ;;  %s2360_s21 = sphi %s2425_s21, %s2997_s21   ;;  %s2356_s20 = sphi %s2423_s20, %s2996_s20   ;;  %s2352_s19 = sphi %s2421_s19, %s2995_s19   ;;  %s2348_s18 = sphi %s2419_s18, %s2994_s18  }
   0x6   : > { %p28_p0 = scmp.ge.s32.totalorder %s27_s27, 2  ;;  %s30_s28 = sadd.s32 1, %s2372_s24 }
   0x7   : > { %s39_s29 = sadd.s32 1, %s2356_s20  ;;  %p46_p1 = scmp.ne.s32.totalorder %s2356_s20, %s2352_s19 }
   0x8   : > { %s3002_s27 = smov (%p28_p0, %s27_s27), 0  ;;  %s3004_s28 = smov (!%p28_p0, %s30_s28), %s2372_s24 }
   0x9   : > { %2988 = sst [smem:[#allocation7_spill]] %s3002_s27  ;;  %s35_s30 = ssub.s32 %s2368_s23, %s3002_s27 }
   0xa   : > { %p47_p2 = scmp.eq.s32.totalorder %s2376_s25, 0  ;;  %p32_p3 = scmp.ge.s32.totalorder %s3004_s28, 2 }
   0xb   : > { %p52_p4 = scmp.ne.s32.totalorder %s2352_s19, %s2348_s18  ;;  %p53_p6 = scmp.eq.s32.totalorder %s2123_s26, 0 }
   0xc   : > { %p2470_p5 = por %p47_p2, %p46_p1  ;;  %s3006_s28 = smov (%p32_p3, %s3004_s28), 0 }
   0xd   : > { %p2476_p7 = por %p53_p6, %p52_p4  ;;  %s34_s8 = ssub.s32 %s2372_s24, %s3006_s28 }
   0xe   : > { %p2199_p8 = scmp.lt.s32.totalorder %s2376_s25, 4  ;;  %s36_s9 = sor.u32 %s35_s30, %s34_s8 }
   0xf   : > { %s198_s10 = sand.u32 1, %s2356_s20   ;;  %p37_p9 = scmp.eq.s32.totalorder %s36_s9, 0 }
  0x10   : > { %s2127_s11 = sshll.u32 %s198_s10, 6  ;;  %s2128_s12 = sshll.u32 %s2372_s24, 4 }
  0x11   : > { %s2486_s13 = scalar_select %p37_p9, %s2356_s20, %s39_s29  }
  0x12   : > { %s207_s14 = sadd.s32 %s2368_s23, %s2128_s12  ;;  %s202_s16 = scalar_lea.vmem [#allocation4], %s2127_s11 }
  0x13   : > { %s2129_s15 = sshll.u32 %s207_s14, 7  ;;  %s210_s17 = sshll.u32 %s202_s16, 4  ;;  %s2494_s17 = int_to_ptr.vmem [resolvable:$true] %s210_s17 }
  0x14   : > { %s2492_s27 = scalar_lea.hbm %s2981_s0, %s2129_s15  ;;  %p2500_p10 = pnand %p2199_p8, %p2470_p5 }
  0x15   : > { %s2505_s30 = scalar_lea.sflag [#allocation5], %s198_s10  ;;  %s2280_s8 = scalar_lea.hbm %s2492_s27, 1024 }
  0x16   : > { %p2281_p12 = scmp.ne.s32.totalorder %s2492_s27, %s2280_s8  ;;  %p2282_p13 = pneg %p2500_p10 }
  0x17   : > { %s2285_s11 = scalar_lea.hbm %s2981_s0, 4096  ;;  %p2286_p2 = scmp.lt.u32.totalorder %s2492_s27, %s2981_s0 }
  0x18   : > { %p2283_p0 = pnand %p2282_p13, %p2281_p12  ;;  %p2287_p3 = scmp.lt.u32.totalorder %s2285_s11, %s2280_s8 }
  0x19   : > { %p2289_p5 = scmp.lt.u32.totalorder %s2280_s8, %s2492_s27 }
  0x1a   : > { %p2284_p1 = pneg %p2283_p0  ;;  %p2288_p4 = por %p2287_p3, %p2286_p2 }
  0x1c   : > { %p2290_p6 = por %p2289_p5, %p2288_p4 }
  0x1e   : > { %p2291_p8 = pnand %p2290_p6, %p2284_p1 }
  0x20   : > { %2294 = shalt.err (!%p2291_p8)
}
  0x21   : > { %s2295_s10 = scalar_lea.vmem %s2494_s17, 1024  ;;  %s2378_s15 = smov [#allocation4]  }
  0x22   : > { %p2296_p9 = scmp.ne.s32.totalorder %s2494_s17, %s2295_s10  ;;  %s2300_s16 = sshll.u32 %s2378_s15, 4  ;;  %s2301_s16 = int_to_ptr.vmem [resolvable:$false] %s2300_s16 }
  0x23   : > { %s2302_s18 = scalar_lea.vmem %s2301_s16, 2048  ;;  %p2303_p11 = scmp.lt.s32.totalorder %s2494_s17, %s2301_s16 }
  0x24   : > { %p2298_p12 = pnand %p2296_p9, %p2282_p13  ;;  %p2304_p2 = scmp.lt.s32.totalorder %s2302_s18, %s2295_s10 }
  0x26   : > { %p2299_p0 = pneg %p2298_p12  ;;  %p2305_p3 = por %p2304_p2, %p2303_p11 }
  0x28   : > { %p2306_p4 = pnand %p2305_p3, %p2299_p0 }
  0x2a   : > { %2309 = shalt.err (!%p2306_p4)
}
  0x2b   : > { %s2379_s26 = smov 256   ;;  %s2380_s8 = smov 128  }
  0x2c   : > { %s2381_s9 = smov 8   ;;  %p218_p13 = scmp.lt.s32.totalorder %s2376_s25, 5 }
  0x2d   : > { %2198 = dma.hbm_to_vmem [thread:$0]  (!%p2500_p10), %s2492_s27, 1024, %s2494_s17, %s2505_s30, %s2379_s26, %s2380_s8, %s2381_s9  }
  0x2e   : > { %p2992_p1 = scmp.ge.s32.totalorder %s2376_s25, 1 }
  0x30   : > { %p219_p5 = pnand %p2992_p1, %p218_p13 }
  0x31   : > { %s224_s6 = sand.u32 (!%p219_p5), 1, %s2352_s19  }
  0x32   : > { %222 = sbr.rel (%p219_p5) target bundleno = 1041 (0x411), region = 40  ;;  %s2131_s11 = sshll.u32 (!%p219_p5), %s224_s6, 6 }
  0x33   : > { %s225_s12 = scalar_lea.sflag (!%p219_p5), [#allocation5], %s224_s6  ;;  %s2537_s14 = scalar_lea.vmem (!%p219_p5), [#allocation4], %s2131_s11 }
  0x39   : > { %2343 = dma.done.wait (%p2476_p7), %s225_s12, 1024  }
  0x3a   : > { %2345 = vsyncadd (%p2476_p7), %s225_s12, 4294966272  ;;  %p255_p11 = scmp.lt.s32.totalorder %s2364_s22, 1  ;;  %p2134_p10 = scmp.ne.s32.totalorder %s2360_s21, 0 }
  0x3b   : > { %vm264_vm0 = vcmask (!%p2134_p10), 516096   ;;  %v2382_v0 = vmov (!%p2134_p10), 0.0   ;;  %v2383_v1 = vmov (!%p2134_p10), -inf  }
  0x3c   : > { %s3008_s22 = smov (!%p255_p11, %s2364_s22), 1  ;;  %263 = sbr.rel (%p2134_p10) target bundleno = 67 (0x43), region = 48 }
  0x3d   : > { %s2145_s27 = sshll.u32 %s3008_s22, 6  ;;  %265 = vst.msk [vmem:[#allocation2] sm:$0x1] (!%p2134_p10), %vm264_vm0, %v2382_v0  ;;  %266 = vst.msk [vmem:[#allocation3] sm:$0x1] (!%p2134_p10), %vm264_vm0, %v2383_v1 }
  0x3e   : > { %s2548_s30 = scalar_lea.vmem %s2986_s5, %s2145_s27 }
  0x43 PF: > { %v267_v2 = vld [vmem:[%s2537_s14] sm:$0xff]  ;;  %v268_v3 = vld [vmem:[%s2537_s14 + $0x8] sm:$0xff]  ;;  %v269_v4 = vld [vmem:[%s2537_s14 + $0x10] sm:$0xff]  ;;  %v2384_v9 = vmov 0   ;;  %v300_v11 = vlaneseq  ;;  %v2385_v12 = vmov 1966171168  }
  0x44   : > { %1046 = vmax.xlane.f32.xlu1 %v267_v2  ;;  %276 = vadd.xlane.f32.xlu0 %v267_v2  ;;  %v270_v5 = vld [vmem:[%s2537_s14 + $0x18] sm:$0xff]  ;;  %v271_v6 = vld [vmem:[%s2537_s14 + $0x20] sm:$0xff]  ;;  %v272_v7 = vld [vmem:[%s2537_s14 + $0x28] sm:$0xff]  ;;  %v561_v13 = vunpack.c.l.s4 %v2385_v12  ;;  %vm983_vm1 = vcmask 130112   ;;  %vm990_vm2 = vcmask 195712   ;;  %vm1004_vm3 = vcmask 326912  }
  0x45   : > { %v273_v8 = vld [vmem:[%s2537_s14 + $0x30] sm:$0xff]  ;;  %2274 = vset.pattern.permute.xlu0 %v2384_v9  ;;  %2275 = vset.pattern.permute.xlu1 %v2384_v9  ;;  %v274_v10 = vld [vmem:[%s2537_s14 + $0x38] sm:$0xff]  ;;  %v2560_v14 = vshrl.u32 %v300_v11, 7  ;;  %vm997_vm4 = vcmask 261312   ;;  %vm1011_vm5 = vcmask 392512   ;;  %vm1018_vm6 = vcmask 458112  }
  0x46   : > { %v562_v15 = vunpack.c.0.s8 %v561_v13  ;;  %vm1025_vm7 = vcmask 523712   ;;  %vm1043_vm8 = vcmask 516096   ;;  %p2135_p7 = scmp.ne.s32.totalorder %s2360_s21, 1 }
  0x47   : > { %v2563_v16 = vsub.s32 0, %v2560_v14  ;;  %v2566_v17 = vsub.s32 1, %v2560_v14  ;;  %v2569_v18 = vsub.s32 2, %v2560_v14  ;;  %v2572_v19 = vsub.s32 3, %v2560_v14 }
  0x48   : > { %1048 = vmax.xlane.f32.xlu1 %v268_v3  ;;  %278 = vadd.xlane.f32.xlu0 %v268_v3  ;;  %v2575_v20 = vsub.s32 4, %v2560_v14  ;;  %v2578_v21 = vsub.s32 5, %v2560_v14  ;;  %v2581_v22 = vsub.s32 6, %v2560_v14  ;;  %v2584_v23 = vsub.s32 7, %v2560_v14 }
  0x49   : > { %v2589_v26 = vsub.s32 %v562_v15, %v2560_v14  ;;  %vm2387_vm9 = vmmov (!%p2135_p7), 0   ;;  %vm1811_vm10 = vcmask (!%p2135_p7), 1040384   ;;  %vm1828_vm11 = vcmask (!%p2135_p7), 523264  }
  0x4a   : > { %vm1915_vm12 = vcmask (!%p2135_p7), 1043456   ;;  %vm1911_vm13 = vcmask (!%p2135_p7), 31744   ;;  %vm2034_vm14 = vcmask (!%p2135_p7), 7168  }
  0x4c   : > { %1050 = vmax.xlane.f32.xlu1 %v269_v4  ;;  %280 = vadd.xlane.f32.xlu0 %v269_v4 }
  0x50   : > { %1052 = vmax.xlane.f32.xlu1 %v270_v5  ;;  %282 = vadd.xlane.f32.xlu0 %v270_v5 }
  0x54   : > { %1054 = vmax.xlane.f32.xlu1 %v271_v6  ;;  %284 = vadd.xlane.f32.xlu0 %v271_v6 }
  0x58   : > { %1056 = vmax.xlane.f32.xlu1 %v272_v7  ;;  %286 = vadd.xlane.f32.xlu0 %v272_v7 }
  0x5c   : > { %1058 = vmax.xlane.f32.xlu1 %v273_v8  ;;  %288 = vadd.xlane.f32.xlu0 %v273_v8 }
  0x60   : > { %1060 = vmax.xlane.f32.xlu1 %v274_v10  ;;  %290 = vadd.xlane.f32.xlu0 %v274_v10 }
  0xd1   : > { %v2586_v24 = vpop.xlane.xlu1 %1046  ;;  %v277_v25 = vpop.xlane.xlu0 %276 }
  0xd2   : > { %v303_v27 = vrot.slane %v277_v25, %v2563_v16  ;;  %v307_v28 = vrot.slane %v277_v25, %v2566_v17  ;;  %v311_v29 = vrot.slane %v277_v25, %v2569_v18  ;;  %v315_v30 = vrot.slane %v277_v25, %v2572_v19 }
  0xd3   : > { %v319_v31 = vrot.slane %v277_v25, %v2575_v20  ;;  %v323_v32 = vrot.slane %v277_v25, %v2578_v21  ;;  %v327_v33 = vrot.slane %v277_v25, %v2581_v22  ;;  %v331_v34 = vrot.slane %v277_v25, %v2584_v23 }
  0xd4   : > { %v556_v35 = vcombine.low %v303_v27, %v307_v28  ;;  %v557_v36 = vcombine.low %v311_v29, %v315_v30  ;;  %v1073_v37 = vrot.slane %v2586_v24, %v2563_v16  ;;  %v1077_v38 = vrot.slane %v2586_v24, %v2566_v17 }
  0xd5   : > { %v2603_v39 = vpop.xlane.xlu1 %1048  ;;  %v279_v40 = vpop.xlane.xlu0 %278  ;;  %v558_v41 = vcombine.low %v319_v31, %v323_v32  ;;  %v559_v42 = vcombine.low %v327_v33, %v331_v34  ;;  %v1081_v43 = vrot.slane %v2586_v24, %v2569_v18  ;;  %v1085_v44 = vrot.slane %v2586_v24, %v2572_v19 }
  0xd6   : > { %v566_v45 = vrot.slane %v556_v35, %v2589_v26  ;;  %v573_v46 = vrot.slane %v557_v36, %v2589_v26  ;;  %v335_v47 = vrot.slane %v279_v40, %v2563_v16  ;;  %v339_v48 = vrot.slane %v279_v40, %v2566_v17 }
  0xd7   : > { %v580_v49 = vrot.slane %v558_v41, %v2589_v26  ;;  %v587_v50 = vrot.slane %v559_v42, %v2589_v26  ;;  %v343_v51 = vrot.slane %v279_v40, %v2569_v18  ;;  %v347_v52 = vrot.slane %v279_v40, %v2572_v19 }
  0xd8   : > { %v588_v53 = vcombine.low %v566_v45, %v573_v46  ;;  %v351_v54 = vrot.slane %v279_v40, %v2575_v20  ;;  %v355_v55 = vrot.slane %v279_v40, %v2578_v21  ;;  %v359_v56 = vrot.slane %v279_v40, %v2581_v22 }
  0xd9   : > { %v2620_v57 = vpop.xlane.xlu1 %1050  ;;  %v281_v58 = vpop.xlane.xlu0 %280  ;;  %v589_v59 = vcombine.low %v580_v49, %v587_v50  ;;  %v363_v60 = vrot.slane %v279_v40, %v2584_v23  ;;  %v605_v61 = vcombine.low %v335_v47, %v339_v48  ;;  %v606_v62 = vcombine.low %v343_v51, %v347_v52 }
  0xda   : > { %v596_v63 = vrot.slane %v588_v53, %v2589_v26  ;;  %v607_v0 = vcombine.low %v351_v54, %v355_v55  ;;  %v367_v1 = vrot.slane %v281_v58, %v2563_v16  ;;  %v371_v2 = vrot.slane %v281_v58, %v2566_v17 }
  0xdb   : > { %v603_v3 = vrot.slane %v589_v59, %v2589_v26  ;;  %v608_v4 = vcombine.low %v359_v56, %v363_v60  ;;  %v615_v5 = vrot.slane %v605_v61, %v2589_v26  ;;  %v622_v6 = vrot.slane %v606_v62, %v2589_v26 }
  0xdc   : > { %v629_v7 = vrot.slane %v607_v0, %v2589_v26  ;;  %v375_v8 = vrot.slane %v281_v58, %v2569_v18  ;;  %v379_v9 = vrot.slane %v281_v58, %v2572_v19  ;;  %v383_v10 = vrot.slane %v281_v58, %v2575_v20 }
  0xdd   : > { %v2633_v12 = vpop.xlane.xlu1 %1052  ;;  %v283_v13 = vpop.xlane.xlu0 %282  ;;  %v604_v15 = vcombine.low %v596_v63, %v603_v3  ;;  %v636_v25 = vrot.slane %v608_v4, %v2589_v26  ;;  %v637_v27 = vcombine.low %v615_v5, %v622_v6  ;;  %v387_v28 = vrot.slane %v281_v58, %v2578_v21 }
  0xde   : > { %v391_v29 = vrot.slane %v281_v58, %v2581_v22  ;;  %v395_v30 = vrot.slane %v281_v58, %v2584_v23  ;;  %v654_v31 = vcombine.low %v367_v1, %v371_v2  ;;  %v655_v32 = vcombine.low %v375_v8, %v379_v9 }
  0xdf   : > { %949 = vperm.xlu0 %2274, %v604_v15   ;;  %v638_v33 = vcombine.low %v629_v7, %v636_v25  ;;  %v645_v34 = vrot.slane %v637_v27, %v2589_v26  ;;  %v656_v35 = vcombine.low %v383_v10, %v387_v28  ;;  %v399_v36 = vrot.slane %v283_v13, %v2563_v16 }
  0xe0   : > { %v657_v40 = vcombine.low %v391_v29, %v395_v30  ;;  %v664_v41 = vrot.slane %v654_v31, %v2589_v26  ;;  %v671_v42 = vrot.slane %v655_v32, %v2589_v26  ;;  %v403_v45 = vrot.slane %v283_v13, %v2566_v17 }
  0xe1   : > { %v652_v46 = vrot.slane %v638_v33, %v2589_v26  ;;  %v678_v47 = vrot.slane %v656_v35, %v2589_v26  ;;  %v407_v48 = vrot.slane %v283_v13, %v2569_v18  ;;  %v411_v49 = vrot.slane %v283_v13, %v2572_v19  ;;  %v1055_v50 = vpop.xlane.xlu1 %1054 }
  0xe2   : > { %v685_v51 = vrot.slane %v657_v40, %v2589_v26  ;;  %v686_v52 = vcombine.low %v664_v41, %v671_v42  ;;  %v415_v53 = vrot.slane %v283_v13, %v2575_v20  ;;  %v419_v54 = vrot.slane %v283_v13, %v2578_v21 }
  0xe3   : > { %v653_v55 = vcombine.low %v645_v34, %v652_v46  ;;  %v423_v56 = vrot.slane %v283_v13, %v2581_v22  ;;  %v427_v58 = vrot.slane %v283_v13, %v2584_v23  ;;  %v703_v59 = vcombine.low %v399_v36, %v403_v45 }
  0xe4   : > { %v687_v60 = vcombine.low %v678_v47, %v685_v51  ;;  %v694_v61 = vrot.slane %v686_v52, %v2589_v26  ;;  %v704_v62 = vcombine.low %v407_v48, %v411_v49  ;;  %v705_v63 = vcombine.low %v415_v53, %v419_v54 }
  0xe5   : > { %952 = vperm.xlu1 %2275, %v653_v55   ;;  %v706_v0 = vcombine.low %v423_v56, %v427_v58  ;;  %v713_v1 = vrot.slane %v703_v59, %v2589_v26  ;;  %v1201_v2 = vrot.slane %v1055_v50, %v2563_v16  ;;  %v1205_v3 = vrot.slane %v1055_v50, %v2566_v17  ;;  %v1057_v40 = vpop.xlane.xlu1 %1056 }
  0xe6   : > { %v701_v4 = vrot.slane %v687_v60, %v2589_v26  ;;  %v720_v5 = vrot.slane %v704_v62, %v2589_v26  ;;  %v727_v6 = vrot.slane %v705_v63, %v2589_v26  ;;  %v1209_v7 = vrot.slane %v1055_v50, %v2569_v18 }
  0xe7   : > { %v734_v8 = vrot.slane %v706_v0, %v2589_v26  ;;  %v1213_v9 = vrot.slane %v1055_v50, %v2572_v19  ;;  %v1217_v10 = vrot.slane %v1055_v50, %v2575_v20  ;;  %v1221_v13 = vrot.slane %v1055_v50, %v2578_v21 }
  0xe8   : > { %v702_v15 = vcombine.low %v694_v61, %v701_v4  ;;  %v735_v25 = vcombine.low %v713_v1, %v720_v5  ;;  %v1225_v27 = vrot.slane %v1055_v50, %v2581_v22  ;;  %v1229_v28 = vrot.slane %v1055_v50, %v2584_v23 }
  0xe9   : > { %v736_v29 = vcombine.low %v727_v6, %v734_v8  ;;  %v1522_v30 = vcombine.low %v1201_v2, %v1205_v3  ;;  %v1523_v31 = vcombine.low %v1209_v7, %v1213_v9  ;;  %v1524_v32 = vcombine.low %v1217_v10, %v1221_v13 }
  0xea   : > { %955 = vperm.xlu1 %2275, %v702_v15   ;;  %v743_v33 = vrot.slane %v735_v25, %v2589_v26  ;;  %v1525_v34 = vcombine.low %v1225_v27, %v1229_v28  ;;  %v1089_v35 = vrot.slane %v2586_v24, %v2575_v20  ;;  %v1093_v36 = vrot.slane %v2586_v24, %v2578_v21  ;;  %v1059_v28 = vpop.xlane.xlu1 %1058 }
  0xeb   : > { %v750_v41 = vrot.slane %v736_v29, %v2589_v26  ;;  %v1532_v42 = vrot.slane %v1522_v30, %v2589_v26  ;;  %v1539_v45 = vrot.slane %v1523_v31, %v2589_v26  ;;  %v1546_v46 = vrot.slane %v1524_v32, %v2589_v26 }
  0xec   : > { %v1553_v47 = vrot.slane %v1525_v34, %v2589_v26  ;;  %v1097_v48 = vrot.slane %v2586_v24, %v2581_v22  ;;  %v1101_v49 = vrot.slane %v2586_v24, %v2584_v23  ;;  %v1326_v50 = vcombine.low %v1073_v37, %v1077_v38 }
  0xed   : > { %v751_v51 = vcombine.low %v743_v33, %v750_v41  ;;  %v1554_v52 = vcombine.low %v1532_v42, %v1539_v45  ;;  %v1327_v53 = vcombine.low %v1081_v43, %v1085_v44  ;;  %v1328_v54 = vcombine.low %v1089_v35, %v1093_v36 }
  0xee   : > { %v1555_v55 = vcombine.low %v1546_v46, %v1553_v47  ;;  %v1329_v56 = vcombine.low %v1097_v48, %v1101_v49  ;;  %v1336_v58 = vrot.slane %v1326_v50, %v2589_v26  ;;  %v1233_v59 = vrot.slane %v1057_v40, %v2563_v16 }
  0xef   : > { %958 = vperm.xlu1 %2275, %v751_v51   ;;  %v1562_v60 = vrot.slane %v1554_v52, %v2589_v26  ;;  %v1343_v37 = vrot.slane %v1327_v53, %v2589_v26  ;;  %v1350_v38 = vrot.slane %v1328_v54, %v2589_v26  ;;  %v1237_v61 = vrot.slane %v1057_v40, %v2566_v17 }
  0xf0   : > { %v1569_v62 = vrot.slane %v1555_v55, %v2589_v26  ;;  %v1357_v24 = vrot.slane %v1329_v56, %v2589_v26  ;;  %v1241_v43 = vrot.slane %v1057_v40, %v2569_v18  ;;  %v1245_v44 = vrot.slane %v1057_v40, %v2572_v19 }
  0xf1   : > { %v1358_v63 = vcombine.low %v1336_v58, %v1343_v37  ;;  %v1249_v0 = vrot.slane %v1057_v40, %v2575_v20  ;;  %v1253_v1 = vrot.slane %v1057_v40, %v2578_v21  ;;  %v1257_v2 = vrot.slane %v1057_v40, %v2581_v22 }
  0xf2   : > { %v1570_v3 = vcombine.low %v1562_v60, %v1569_v62  ;;  %v1359_v4 = vcombine.low %v1350_v38, %v1357_v24  ;;  %v1261_v5 = vrot.slane %v1057_v40, %v2584_v23  ;;  %v1571_v6 = vcombine.low %v1233_v59, %v1237_v61 }
  0xf3   : > { %v1366_v7 = vrot.slane %v1358_v63, %v2589_v26  ;;  %v1572_v8 = vcombine.low %v1241_v43, %v1245_v44  ;;  %v1573_v9 = vcombine.low %v1249_v0, %v1253_v1  ;;  %v1105_v10 = vrot.slane %v2603_v39, %v2563_v16 }
  0xf4   : > { %1731 = vperm.xlu0 %2274, %v1570_v3   ;;  %v1373_v13 = vrot.slane %v1359_v4, %v2589_v26  ;;  %v1574_v15 = vcombine.low %v1257_v2, %v1261_v5  ;;  %v1581_v25 = vrot.slane %v1571_v6, %v2589_v26  ;;  %v1109_v27 = vrot.slane %v2603_v39, %v2566_v17 }
  0xf5   : > { %v1588_v29 = vrot.slane %v1572_v8, %v2589_v26  ;;  %v1595_v30 = vrot.slane %v1573_v9, %v2589_v26  ;;  %v1113_v31 = vrot.slane %v2603_v39, %v2569_v18  ;;  %v1117_v32 = vrot.slane %v2603_v39, %v2572_v19  ;;  %v1061_v9 = vpop.xlane.xlu1 %1060 }
  0xf6   : > { %v1374_v33 = vcombine.low %v1366_v7, %v1373_v13  ;;  %v1602_v34 = vrot.slane %v1574_v15, %v2589_v26  ;;  %v1121_v35 = vrot.slane %v2603_v39, %v2575_v20  ;;  %v1125_v36 = vrot.slane %v2603_v39, %v2578_v21 }
  0xf7   : > { %v1603_v40 = vcombine.low %v1581_v25, %v1588_v29  ;;  %v1129_v41 = vrot.slane %v2603_v39, %v2581_v22  ;;  %v1133_v42 = vrot.slane %v2603_v39, %v2584_v23  ;;  %v1375_v45 = vcombine.low %v1105_v10, %v1109_v27 }
  0xf8   : > { %1719 = vperm.xlu1 %2275, %v1374_v33   ;;  %v1604_v46 = vcombine.low %v1595_v30, %v1602_v34  ;;  %v1376_v47 = vcombine.low %v1113_v31, %v1117_v32  ;;  %v1377_v48 = vcombine.low %v1121_v35, %v1125_v36  ;;  %v1265_v49 = vrot.slane %v1059_v28, %v2563_v16 }
  0xf9   : > { %v1611_v50 = vrot.slane %v1603_v40, %v2589_v26  ;;  %v1378_v51 = vcombine.low %v1129_v41, %v1133_v42  ;;  %v1385_v52 = vrot.slane %v1375_v45, %v2589_v26  ;;  %v1269_v53 = vrot.slane %v1059_v28, %v2566_v17 }
  0xfa   : > { %v1618_v54 = vrot.slane %v1604_v46, %v2589_v26  ;;  %v1392_v55 = vrot.slane %v1376_v47, %v2589_v26  ;;  %v1399_v39 = vrot.slane %v1377_v48, %v2589_v26  ;;  %v1273_v56 = vrot.slane %v1059_v28, %v2569_v18 }
  0xfb   : > { %v1406_v58 = vrot.slane %v1378_v51, %v2589_v26  ;;  %v1277_v59 = vrot.slane %v1059_v28, %v2572_v19  ;;  %v1281_v60 = vrot.slane %v1059_v28, %v2575_v20  ;;  %v1285_v37 = vrot.slane %v1059_v28, %v2578_v21 }
  0xfc   : > { %v1619_v38 = vcombine.low %v1611_v50, %v1618_v54  ;;  %v1407_v61 = vcombine.low %v1385_v52, %v1392_v55  ;;  %v1289_v62 = vrot.slane %v1059_v28, %v2581_v22  ;;  %v1293_v24 = vrot.slane %v1059_v28, %v2584_v23 }
  0xfd   : > { %v1408_v43 = vcombine.low %v1399_v39, %v1406_v58  ;;  %v1620_v44 = vcombine.low %v1265_v49, %v1269_v53  ;;  %v1621_v63 = vcombine.low %v1273_v56, %v1277_v59  ;;  %v1622_v0 = vcombine.low %v1281_v60, %v1285_v37  ;;  %v285_v59 = vpop.xlane.xlu0 %284 }
  0xfe   : > { %1734 = vperm.xlu0 %2274, %v1619_v38   ;;  %v1415_v1 = vrot.slane %v1407_v61, %v2589_v26  ;;  %v1623_v2 = vcombine.low %v1289_v62, %v1293_v24  ;;  %v1137_v3 = vrot.slane %v2620_v57, %v2563_v16  ;;  %v1141_v4 = vrot.slane %v2620_v57, %v2566_v17 }
  0xff   : > { %v1422_v5 = vrot.slane %v1408_v43, %v2589_v26  ;;  %v1630_v6 = vrot.slane %v1620_v44, %v2589_v26  ;;  %v1637_v7 = vrot.slane %v1621_v63, %v2589_v26  ;;  %v1644_v8 = vrot.slane %v1622_v0, %v2589_v26 }
 0x100   : > { %v1651_v10 = vrot.slane %v1623_v2, %v2589_v26  ;;  %v1145_v13 = vrot.slane %v2620_v57, %v2569_v18  ;;  %v1149_v15 = vrot.slane %v2620_v57, %v2572_v19  ;;  %v1153_v25 = vrot.slane %v2620_v57, %v2575_v20 }
 0x101   : > { %v1423_v27 = vcombine.low %v1415_v1, %v1422_v5  ;;  %v1652_v28 = vcombine.low %v1630_v6, %v1637_v7  ;;  %v1157_v29 = vrot.slane %v2620_v57, %v2578_v21  ;;  %v1161_v30 = vrot.slane %v2620_v57, %v2581_v22 }
 0x102   : > { %v1653_v31 = vcombine.low %v1644_v8, %v1651_v10  ;;  %v1165_v32 = vrot.slane %v2620_v57, %v2584_v23  ;;  %v1424_v33 = vcombine.low %v1137_v3, %v1141_v4  ;;  %v1425_v34 = vcombine.low %v1145_v13, %v1149_v15 }
 0x103   : > { %1722 = vperm.xlu1 %2275, %v1423_v27   ;;  %v1660_v35 = vrot.slane %v1652_v28, %v2589_v26  ;;  %v1426_v36 = vcombine.low %v1153_v25, %v1157_v29  ;;  %v1297_v40 = vrot.slane %v1061_v9, %v2563_v16  ;;  %v1301_v41 = vrot.slane %v1061_v9, %v2566_v17  ;;  %v287_v28 = vpop.xlane.xlu0 %286 }
 0x104   : > { %v1667_v42 = vrot.slane %v1653_v31, %v2589_v26  ;;  %v1427_v45 = vcombine.low %v1161_v30, %v1165_v32  ;;  %v1434_v46 = vrot.slane %v1424_v33, %v2589_v26  ;;  %v1441_v47 = vrot.slane %v1425_v34, %v2589_v26 }
 0x105   : > { %v1448_v48 = vrot.slane %v1426_v36, %v2589_v26  ;;  %v1305_v57 = vrot.slane %v1061_v9, %v2569_v18  ;;  %v1309_v49 = vrot.slane %v1061_v9, %v2572_v19  ;;  %v1313_v50 = vrot.slane %v1061_v9, %v2575_v20 }
 0x106   : > { %v1668_v51 = vcombine.low %v1660_v35, %v1667_v42  ;;  %v1455_v52 = vrot.slane %v1427_v45, %v2589_v26  ;;  %v1456_v53 = vcombine.low %v1434_v46, %v1441_v47  ;;  %v1317_v54 = vrot.slane %v1061_v9, %v2578_v21 }
 0x107   : > { %v1321_v55 = vrot.slane %v1061_v9, %v2581_v22  ;;  %v1325_v39 = vrot.slane %v1061_v9, %v2584_v23  ;;  %v1669_v56 = vcombine.low %v1297_v40, %v1301_v41  ;;  %v1670_v58 = vcombine.low %v1305_v57, %v1309_v49 }
 0x108   : > { %1737 = vperm.xlu0 %2274, %v1668_v51   ;;  %v1457_v60 = vcombine.low %v1448_v48, %v1455_v52  ;;  %v1464_v37 = vrot.slane %v1456_v53, %v2589_v26  ;;  %v1671_v38 = vcombine.low %v1313_v50, %v1317_v54  ;;  %v1169_v61 = vrot.slane %v2633_v12, %v2563_v16 }
 0x109   : > { %v1672_v62 = vcombine.low %v1321_v55, %v1325_v39  ;;  %v1679_v24 = vrot.slane %v1669_v56, %v2589_v26  ;;  %v1686_v43 = vrot.slane %v1670_v58, %v2589_v26  ;;  %v1173_v44 = vrot.slane %v2633_v12, %v2566_v17  ;;  %v289_v39 = vpop.xlane.xlu0 %288 }
 0x10a   : > { %v1471_v63 = vrot.slane %v1457_v60, %v2589_v26  ;;  %v1693_v0 = vrot.slane %v1671_v38, %v2589_v26  ;;  %v1177_v1 = vrot.slane %v2633_v12, %v2569_v18  ;;  %v1181_v2 = vrot.slane %v2633_v12, %v2572_v19 }
 0x10b   : > { %v1700_v3 = vrot.slane %v1672_v62, %v2589_v26  ;;  %v1701_v4 = vcombine.low %v1679_v24, %v1686_v43  ;;  %v1185_v5 = vrot.slane %v2633_v12, %v2575_v20  ;;  %v1189_v6 = vrot.slane %v2633_v12, %v2578_v21 }
 0x10c   : > { %v1472_v7 = vcombine.low %v1464_v37, %v1471_v63  ;;  %v1193_v8 = vrot.slane %v2633_v12, %v2581_v22  ;;  %v1197_v9 = vrot.slane %v2633_v12, %v2584_v23  ;;  %v1473_v10 = vcombine.low %v1169_v61, %v1173_v44 }
 0x10d   : > { %v1702_v13 = vcombine.low %v1693_v0, %v1700_v3  ;;  %v1709_v15 = vrot.slane %v1701_v4, %v2589_v26  ;;  %v1474_v25 = vcombine.low %v1177_v1, %v1181_v2  ;;  %v1475_v27 = vcombine.low %v1185_v5, %v1189_v6 }
 0x10e   : > { %1725 = vperm.xlu1 %2275, %v1472_v7   ;;  %v1476_v29 = vcombine.low %v1193_v8, %v1197_v9  ;;  %v1483_v30 = vrot.slane %v1473_v10, %v2589_v26  ;;  %v431_v31 = vrot.slane %v285_v59, %v2563_v16  ;;  %v435_v32 = vrot.slane %v285_v59, %v2566_v17 }
 0x10f   : > { %v1716_v33 = vrot.slane %v1702_v13, %v2589_v26  ;;  %v1490_v34 = vrot.slane %v1474_v25, %v2589_v26  ;;  %v1497_v12 = vrot.slane %v1475_v27, %v2589_v26  ;;  %v439_v35 = vrot.slane %v285_v59, %v2569_v18 }
 0x110   : > { %v1504_v36 = vrot.slane %v1476_v29, %v2589_v26  ;;  %v443_v40 = vrot.slane %v285_v59, %v2572_v19  ;;  %v447_v41 = vrot.slane %v285_v59, %v2575_v20  ;;  %v451_v42 = vrot.slane %v285_v59, %v2578_v21 }
 0x111   : > { %v1717_v45 = vcombine.low %v1709_v15, %v1716_v33  ;;  %v1505_v46 = vcombine.low %v1483_v30, %v1490_v34  ;;  %v455_v47 = vrot.slane %v285_v59, %v2581_v22  ;;  %v459_v48 = vrot.slane %v285_v59, %v2584_v23  ;;  %v291_v15 = vpop.xlane.xlu0 %290 }
 0x112   : > { %v1506_v57 = vcombine.low %v1497_v12, %v1504_v36  ;;  %v752_v49 = vcombine.low %v431_v31, %v435_v32  ;;  %v753_v50 = vcombine.low %v439_v35, %v443_v40  ;;  %v754_v51 = vcombine.low %v447_v41, %v451_v42 }
 0x113   : > { %1740 = vperm.xlu0 %2274, %v1717_v45   ;;  %v1513_v52 = vrot.slane %v1505_v46, %v2589_v26  ;;  %v755_v53 = vcombine.low %v455_v47, %v459_v48  ;;  %v463_v54 = vrot.slane %v287_v28, %v2563_v16  ;;  %v467_v55 = vrot.slane %v287_v28, %v2566_v17 }
 0x114   : > { %v1520_v56 = vrot.slane %v1506_v57, %v2589_v26  ;;  %v762_v58 = vrot.slane %v752_v49, %v2589_v26  ;;  %v769_v60 = vrot.slane %v753_v50, %v2589_v26  ;;  %v776_v59 = vrot.slane %v754_v51, %v2589_v26 }
 0x115   : > { %v783_v37 = vrot.slane %v755_v53, %v2589_v26  ;;  %v471_v38 = vrot.slane %v287_v28, %v2569_v18  ;;  %v475_v61 = vrot.slane %v287_v28, %v2572_v19  ;;  %v479_v62 = vrot.slane %v287_v28, %v2575_v20 }
 0x116   : > { %v1521_v24 = vcombine.low %v1513_v52, %v1520_v56  ;;  %v784_v43 = vcombine.low %v762_v58, %v769_v60  ;;  %v483_v44 = vrot.slane %v287_v28, %v2578_v21  ;;  %v487_v63 = vrot.slane %v287_v28, %v2581_v22 }
 0x117   : > { %v785_v0 = vcombine.low %v776_v59, %v783_v37  ;;  %v491_v1 = vrot.slane %v287_v28, %v2584_v23  ;;  %v801_v2 = vcombine.low %v463_v54, %v467_v55  ;;  %v802_v3 = vcombine.low %v471_v38, %v475_v61 }
 0x118   : > { %1728 = vperm.xlu1 %2275, %v1521_v24   ;;  %v792_v4 = vrot.slane %v784_v43, %v2589_v26  ;;  %v803_v5 = vcombine.low %v479_v62, %v483_v44  ;;  %v495_v6 = vrot.slane %v289_v39, %v2563_v16  ;;  %v499_v7 = vrot.slane %v289_v39, %v2566_v17 }
 0x119   : > { %v799_v8 = vrot.slane %v785_v0, %v2589_v26  ;;  %v804_v9 = vcombine.low %v487_v63, %v491_v1  ;;  %v811_v10 = vrot.slane %v801_v2, %v2589_v26  ;;  %v818_v13 = vrot.slane %v802_v3, %v2589_v26 }
 0x11a   : > { %v825_v25 = vrot.slane %v803_v5, %v2589_v26  ;;  %v503_v27 = vrot.slane %v289_v39, %v2569_v18  ;;  %v507_v28 = vrot.slane %v289_v39, %v2572_v19  ;;  %v511_v29 = vrot.slane %v289_v39, %v2575_v20 }
 0x11b   : > { %v800_v30 = vcombine.low %v792_v4, %v799_v8  ;;  %v832_v31 = vrot.slane %v804_v9, %v2589_v26  ;;  %v833_v32 = vcombine.low %v811_v10, %v818_v13  ;;  %v515_v33 = vrot.slane %v289_v39, %v2578_v21 }
 0x11c   : > { %v519_v34 = vrot.slane %v289_v39, %v2581_v22  ;;  %v523_v12 = vrot.slane %v289_v39, %v2584_v23  ;;  %v850_v35 = vcombine.low %v495_v6, %v499_v7  ;;  %v851_v36 = vcombine.low %v503_v27, %v507_v28 }
 0x11d   : > { %961 = vperm.xlu1 %2275, %v800_v30   ;;  %v834_v40 = vcombine.low %v825_v25, %v832_v31  ;;  %v841_v41 = vrot.slane %v833_v32, %v2589_v26  ;;  %v852_v42 = vcombine.low %v511_v29, %v515_v33  ;;  %v527_v45 = vrot.slane %v291_v15, %v2563_v16 }
 0x11e   : > { %v853_v46 = vcombine.low %v519_v34, %v523_v12  ;;  %v860_v47 = vrot.slane %v850_v35, %v2589_v26  ;;  %v867_v48 = vrot.slane %v851_v36, %v2589_v26  ;;  %v531_v57 = vrot.slane %v291_v15, %v2566_v17 }
 0x11f   : > { %v848_v49 = vrot.slane %v834_v40, %v2589_v26  ;;  %v874_v50 = vrot.slane %v852_v42, %v2589_v26  ;;  %v535_v51 = vrot.slane %v291_v15, %v2569_v18  ;;  %v539_v52 = vrot.slane %v291_v15, %v2572_v19 }
 0x120   : > { %v881_v53 = vrot.slane %v853_v46, %v2589_v26  ;;  %v882_v54 = vcombine.low %v860_v47, %v867_v48  ;;  %v543_v55 = vrot.slane %v291_v15, %v2575_v20  ;;  %v547_v39 = vrot.slane %v291_v15, %v2578_v21 }
 0x121   : > { %v849_v56 = vcombine.low %v841_v41, %v848_v49  ;;  %v551_v58 = vrot.slane %v291_v15, %v2581_v22  ;;  %v555_v17 = vrot.slane %v291_v15, %v2584_v23  ;;  %v899_v60 = vcombine.low %v527_v45, %v531_v57 }
 0x122   : > { %v883_v59 = vcombine.low %v874_v50, %v881_v53  ;;  %v890_v37 = vrot.slane %v882_v54, %v2589_v26  ;;  %v900_v38 = vcombine.low %v535_v51, %v539_v52  ;;  %v901_v18 = vcombine.low %v543_v55, %v547_v39 }
 0x123   : > { %964 = vperm.xlu1 %2275, %v849_v56   ;;  %v902_v19 = vcombine.low %v551_v58, %v555_v17  ;;  %v909_v61 = vrot.slane %v899_v60, %v2589_v26  ;;  %v973_v8 = vand.u32 127, %v300_v11  ;;  %v1045_v60 = vld [vmem:[#allocation3] sm:$0x1] }
 0x124   : > { %v897_v62 = vrot.slane %v883_v59, %v2589_v26  ;;  %v916_v20 = vrot.slane %v900_v38, %v2589_v26  ;;  %v923_v21 = vrot.slane %v901_v18, %v2589_v26 }
 0x125   : > { %v930_v22 = vrot.slane %v902_v19, %v2589_v26  ;;  %v978_v10 = vadd.s32 4294967288, %v973_v8  ;;  %v985_v13 = vadd.s32 4294967280, %v973_v8  ;;  %v999_v15 = vadd.s32 4294967264, %v973_v8 }
 0x126   : > { %v898_v24 = vcombine.low %v890_v37, %v897_v62  ;;  %v931_v23 = vcombine.low %v909_v61, %v916_v20  ;;  %v992_v28 = vadd.s32 4294967272, %v973_v8  ;;  %v1006_v29 = vadd.s32 4294967256, %v973_v8 }
 0x127   : > { %v932_v43 = vcombine.low %v923_v21, %v930_v22  ;;  %v981_v27 = vsub.s32 %v978_v10, %v2560_v14  ;;  %v988_v30 = vsub.s32 %v985_v13, %v2560_v14  ;;  %v1002_v31 = vsub.s32 %v999_v15, %v2560_v14  ;;  %v1814_v10 = vld [vmem:[%s2982_s1 + $0x8] sm:$0xff] (!%p2135_p7)  ;;  %v1815_v13 = vld [vmem:[%s2982_s1 + $0x10] sm:$0xff] (!%p2135_p7) }
 0x128   : > { %967 = vperm.xlu1 %2275, %v898_v24   ;;  %v939_v44 = vrot.slane %v931_v23, %v2589_v26  ;;  %v1013_v32 = vadd.s32 4294967248, %v973_v8  ;;  %v976_v34 = vsub.s32 %v973_v8, %v2560_v14  ;;  %v1020_v35 = vadd.s32 4294967240, %v973_v8 }
 0x129   : > { %v946_v63 = vrot.slane %v932_v43, %v2589_v26  ;;  %v995_v36 = vsub.s32 %v992_v28, %v2560_v14  ;;  %v1009_v41 = vsub.s32 %v1006_v29, %v2560_v14  ;;  %v2386_v15 = vmov (!%p2135_p7), 0.0|0.0   ;;  %v1817_v29 = vld [vmem:[%s2982_s1 + $0x20] sm:$0xff] (!%p2135_p7) }
 0x12a   : > { %v1016_v45 = vsub.s32 %v1013_v32, %v2560_v14  ;;  %v1023_v57 = vsub.s32 %v1020_v35, %v2560_v14  ;;  %2181 = vmatprep.subr.bf16.mxu0 (!%p2135_p7), %v2386_v15  ;;  %v1819_v32 = vld [vmem:[%s2982_s1 + $0x30] sm:$0xff] (!%p2135_p7) }
 0x12b   : > { %v947_v0 = vcombine.low %v939_v44, %v946_v63 }
 0x12d   : > { %970 = vperm.xlu1 %2275, %v947_v0  }
 0x15e   : > { %v2871_v4 = vpop.permute.xlu0 %949 }
 0x15f   : > { %v977_v61 = vrot.slane %v2871_v4, %v976_v34 }
 0x164   : > { %v2865_v1 = vpop.permute.xlu1 %952 }
 0x165   : > { %v982_v18 = vrot.slane %v2865_v1, %v981_v27 }
 0x167   : > { %v984_v22 = vsel %vm983_vm1, %v982_v18, %v977_v61 }
 0x169   : > { %v2867_v2 = vpop.permute.xlu1 %955 }
 0x16a   : > { %v989_v19 = vrot.slane %v2867_v2, %v988_v30 }
 0x16c   : > { %v991_v23 = vsel %vm990_vm2, %v989_v19, %v984_v22 }
 0x16e   : > { %v2869_v3 = vpop.permute.xlu1 %958 }
 0x16f   : > { %v996_v62 = vrot.slane %v2869_v3, %v995_v36 }
 0x171   : > { %v998_v44 = vsel %vm997_vm4, %v996_v62, %v991_v23 }
 0x173   : > { %v1732_v6 = vpop.permute.xlu0 %1731 }
 0x174   : > { %v1764_v42 = vrot.slane %v1732_v6, %v1002_v31  ;;  %v275_v6 = vld [vmem:[#allocation2] sm:$0x1] }
 0x177   : > { %v1720_v5 = vpop.permute.xlu1 %1719 }
 0x178   : > { %v1745_v40 = vrot.slane %v1720_v5, %v976_v34 }
 0x17d   : > { %v1735_v9 = vpop.permute.xlu0 %1734 }
 0x17e   : > { %v1769_v51 = vrot.slane %v1735_v9, %v1009_v41  ;;  %v1813_v9 = vld [vmem:[%s2982_s1] sm:$0xff] (!%p2135_p7) }
 0x182   : > { %v1723_v7 = vpop.permute.xlu1 %1722 }
 0x183   : > { %v1749_v12 = vrot.slane %v1723_v7, %v981_v27  ;;  %v2388_v27 = vmov (!%p2135_p7), 0.0  }
 0x184   : > { %2173 = vmatprep.mubr.msk.f32.mxu0 (!%p2135_p7), %vm2387_vm9, %v2388_v27  ;;  %2176 = vmatprep.subr.mxu1 (!%p2135_p7), %v2388_v27 }
 0x185   : > { %v1750_v47 = vsel %vm983_vm1, %v1749_v12, %v1745_v40  ;;  %2178 = vmatprep.mubr.msk.f32.mxu1 (!%p2135_p7), %vm2387_vm9, %v2388_v27  ;;  %v1903_v40 = vld [vmem:[%s2984_s3] sm:$0xf] (!%p2135_p7) }
 0x186   : > { %2177 = vmatpush3.msk.msra.mxu1 (!%p2135_p7), %vm1915_vm12, %v1903_v40 }
 0x187   : > { %v1738_v33 = vpop.permute.xlu0 %1737 }
 0x188   : > { %v1774_v53 = vrot.slane %v1738_v33, %v1016_v45  ;;  %v1820_v33 = vld [vmem:[%s2982_s1 + $0x38] sm:$0xff] (!%p2135_p7) }
 0x189   : > { %v2191_v12 = vpack.c.bf16 (!%p2135_p7), %v1820_v33, %v1819_v32 }
 0x18d   : > { %v1726_v25 = vpop.permute.xlu1 %1725 }
 0x18e   : > { %v1754_v11 = vrot.slane %v1726_v25, %v988_v30  ;;  %v1816_v25 = vld [vmem:[%s2982_s1 + $0x18] sm:$0xff] (!%p2135_p7)  ;;  %v1818_v30 = vld [vmem:[%s2982_s1 + $0x28] sm:$0xff] (!%p2135_p7) }
 0x18f   : > { %v2185_v28 = vpack.c.bf16 (!%p2135_p7), %v1816_v25, %v1815_v13 }
 0x190   : > { %v1755_v49 = vsel %vm990_vm2, %v1754_v11, %v1750_v47 }
 0x192   : > { %v1741_v50 = vpop.permute.xlu0 %1740 }
 0x193   : > { %v1779_v39 = vrot.slane %v1741_v50, %v1023_v57 }
 0x197   : > { %v1729_v46 = vpop.permute.xlu1 %1728 }
 0x198   : > { %v1759_v48 = vrot.slane %v1729_v46, %v995_v36 }
 0x19a   : > { %v1760_v52 = vsel %vm997_vm4, %v1759_v48, %v1755_v49  ;;  %v2139_v48 = vld [vmem:[%s2985_s4] ss:$0 sm:$0xff] (!%p2135_p7) }
 0x19b   : > { %v1765_v54 = vsel %vm1004_vm3, %v1764_v42, %v1760_v52 }
 0x19c   : > { %v1770_v55 = vsel %vm1011_vm5, %v1769_v51, %v1765_v54  ;;  %v962_v56 = vpop.permute.xlu1 %961 }
 0x19d   : > { %v1775_v58 = vsel %vm1018_vm6, %v1774_v53, %v1770_v55  ;;  %v1003_v21 = vrot.slane %v962_v56, %v1002_v31  ;;  %v2188_v31 = vpack.c.bf16 (!%p2135_p7), %v1818_v30, %v1817_v29 }
 0x19e   : > { %v1780_v14 = vsel %vm1025_vm7, %v1779_v39, %v1775_v58 }
 0x19f   : > { %v1787_v17 = vrot.slane %v1780_v14, %v2589_v26  ;;  %v1005_v63 = vsel %vm1004_vm3, %v1003_v21, %v998_v44 }
 0x1a1   : > { %v1794_v59 = vrot.slane %v1787_v17, %v2589_v26 }
 0x1a2   : > { %v965_v37 = vpop.permute.xlu1 %964 }
 0x1a3   : > { %v1796_v38 = vmax.f32 %v1045_v60, %v1794_v59  ;;  %v1010_v24 = vrot.slane %v965_v37, %v1009_v41  ;;  %v2137_v41 = vld [vmem:[%s2983_s2] ss:$0 sm:$0xff] (!%p2135_p7) }
 0x1a5   : > { %1797 = vst.msk [vmem:[#allocation3] sm:$0x1] %vm1043_vm8, %v1796_v38  ;;  %v1012_v1 = vsel %vm1011_vm5, %v1010_v24, %v1005_v63 }
 0x1a7   : > { %v968_v20 = vpop.permute.xlu1 %967 }
 0x1a8   : > { %v1017_v43 = vrot.slane %v968_v20, %v1016_v45 }
 0x1aa   : > { %v1019_v4 = vsel %vm1018_vm6, %v1017_v43, %v1012_v1 }
 0x1ac   : > { %v971_v0 = vpop.permute.xlu1 %970  ;;  %v2136_v11 = vld [vmem:[#allocation3] ss:$0 sm:$0xff] (!%p2135_p7) }
 0x1ad   : > { %v1024_v2 = vrot.slane %v971_v0, %v1023_v57 }
 0x1af   : > { %v1026_v3 = vsel %vm1025_vm7, %v1024_v2, %v1019_v4 }
 0x1b0   : > { %v1033_v5 = vrot.slane %v1026_v3, %v2589_v26  ;;  %1801 = sbr.rel (%p2135_p7) target bundleno = 1041 (0x411), region = 52 }
 0x1b2   : > { %v1040_v7 = vrot.slane %v1033_v5, %v2589_v26  ;;  %v2182_v26 = vpack.c.bf16 (!%p2135_p7), %v1814_v10, %v1813_v9 }
 0x1b4   : > { %v1042_v8 = vadd.f32 %v1040_v7, %v275_v6  ;;  %2183 = vmatpush3.bf16.msra.mxu0 (!%p2135_p7), %v2182_v26 }
 0x1b5   : > { %2184 = vmatprep.subr.bf16.mxu0 (!%p2135_p7), %v2386_v15 }
 0x1b6   : > { %1044 = vst.msk [vmem:[#allocation2] sm:$0x1] %vm1043_vm8, %v1042_v8 }
 0x1b8   : > { %2186 = vmatpush3.bf16.msra.mxu0 %v2185_v28 }
 0x1b9   : > { %2187 = vmatprep.subr.bf16.mxu0 %v2386_v15 }
 0x1bc   : > { %2189 = vmatpush3.bf16.msra.mxu0 %v2188_v31 }
 0x1bd   : > { %v1802_v34 = vld [vmem:[#allocation2] sm:$0x1]  ;;  %2190 = vmatprep.subr.bf16.mxu0 %v2386_v15 }
 0x1be   : > { %v1803_v35 = vmul.f32 0.00390625, %v1802_v34 }
 0x1c0   : > { %2192 = vmatpush3.bf16.msra.mxu0 %v2191_v12  ;;  %v1812_v36 = vsel %vm1811_vm10, %v1803_v35, %v2136_v11 }
 0x1c3   : > { %2174 = vmatmul.mubr.msk.f32.vlgmr.msra.gmra.mrb[0].mxu0 %vm1828_vm11, %v1812_v36 }
 0x296   : > { %v1898_v42 = vpop.f32.mrb[0].mxu0 }
 0x297   : > { %v1899_v45 = vadd.f32 %v2137_v41, %v1898_v42  ;;  %v2175_v46 = vpop.f32.mrb[1].mxu0 }
 0x299   : > { %v1902_v47 = vmax.f32 %v1899_v45, 0.0 }
 0x29b   : > { %2179 = vmatmul.mubr.msk.f32.vlgmr.msra.gmra.mrb[0].mxu1 %vm1911_vm13, %v1902_v47 }
 0x36e   : > { %v1985_v57 = vpop.f32.mrb[0].mxu1 }
 0x36f   : > { %v1986_v49 = vadd.f32 %v2139_v48, %v1985_v57  ;;  %v2180_v50 = vpop.f32.mrb[1].mxu1 }
 0x371   : > { %v1990_v51 = vrot.slane %v1986_v49, 1 }
 0x373   : > { %v1992_v52 = vadd.f32 %v1990_v51, %v1986_v49 }
 0x375   : > { %v2142_v53 = vmul.f32 -1.442695, %v1992_v52 }
 0x377   : > { %2276 = vpow2.f32 %v2142_v53 }
 0x381   : > { %v2277_v54 = vpop.eup %2276 }
 0x382   : > { %v1996_v55 = vadd.f32 1.0, %v2277_v54 }
 0x384   : > { %2278 = vrcp.f32 %v1996_v55 }
 0x38e   : > { %v2279_v39 = vpop.eup %2278 }
 0x38f   : > { %v2002_v56 = vrot.slane %v2279_v39, %v2563_v16 }
 0x391   : > { %2012 = vbcast.lane.b32.xlu1 %v2002_v56, 272  ;;  %2004 = vbcast.lane.b32.xlu0 %v2002_v56, 256 }
 0x395   : > { %2016 = vbcast.lane.b32.xlu1 %v2002_v56, 280  ;;  %2008 = vbcast.lane.b32.xlu0 %v2002_v56, 264 }
 0x399   : > { %2024 = vbcast.lane.b32.xlu1 %v2002_v56, 296  ;;  %2020 = vbcast.lane.b32.xlu0 %v2002_v56, 288 }
 0x39d   : > { %2032 = vbcast.lane.b32.xlu1 %v2002_v56, 312  ;;  %2028 = vbcast.lane.b32.xlu0 %v2002_v56, 304 }
 0x403   : > { %v2013_v58 = vpop.permute.xlu1 %2012  ;;  %v2005_v14 = vpop.permute.xlu0 %2004 }
 0x404   : > { %2037 = vst.msk [vmem:[%s2548_s30 + $0x10] sm:$0xff] %vm2034_vm14, %v2013_v58  ;;  %2035 = vst.msk [vmem:[%s2548_s30] sm:$0xff] %vm2034_vm14, %v2005_v14 }
 0x407   : > { %v2017_v16 = vpop.permute.xlu1 %2016  ;;  %v2009_v17 = vpop.permute.xlu0 %2008 }
 0x408   : > { %2038 = vst.msk [vmem:[%s2548_s30 + $0x18] sm:$0xff] %vm2034_vm14, %v2017_v16  ;;  %2036 = vst.msk [vmem:[%s2548_s30 + $0x8] sm:$0xff] %vm2034_vm14, %v2009_v17 }
 0x40b   : > { %v2025_v60 = vpop.permute.xlu1 %2024  ;;  %v2021_v59 = vpop.permute.xlu0 %2020 }
 0x40c   : > { %2040 = vst.msk [vmem:[%s2548_s30 + $0x28] sm:$0xff] %vm2034_vm14, %v2025_v60  ;;  %2039 = vst.msk [vmem:[%s2548_s30 + $0x20] sm:$0xff] %vm2034_vm14, %v2021_v59 }
 0x40f   : > { %v2033_v37 = vpop.permute.xlu1 %2032  ;;  %v2029_v38 = vpop.permute.xlu0 %2028 }
 0x410   : > { %2042 = vst.msk [vmem:[%s2548_s30 + $0x38] sm:$0xff] %vm2034_vm14, %v2033_v37  ;;  %2041 = vst.msk [vmem:[%s2548_s30 + $0x30] sm:$0xff] %vm2034_vm14, %v2029_v38 }
 0x411 PF: > { %s18_s25 = sadd.s32 1, %s2376_s25   ;;  %s2993_s26 = sld [smem:[#allocation7_spill]] }
 0x412   : > { %p15_p6 = scmp.ge.s32.totalorder %s18_s25, 6   ;;  %s2994_s18 = smov %s2352_s19 }
 0x413   : > { %s2995_s19 = smov %s2356_s20  ;;  %s2996_s20 = smov %s2486_s13 }
 0x414   : > { %s2997_s21 = smov %s2368_s23  ;;  %s2998_s22 = smov %s2372_s24 }
 0x415   : > { %s3000_s24 = smov %s3006_s28  ;;  %17 = sbr.rel (!%p15_p6) target bundleno = 5 (0x5), region = 88 }
 0x417   : > { %s2999_s23 = smov %s2993_s26 }
 0x41c   :  { %2064 = vsyncpa [#allocation5], 1 }
 0x41d   :  { %2066 = vsyncpa [#allocation5 + $0x1], 1 }

</bundles_post_ra>
